<compile_context>
chip_gen: v7x
topology: tpu7x:2x2x1
jax: 0.10.0
libtpu: 0.0.40
codegen_flags: <defaults>
</compile_context>

<pallas_src>
import jax
import jax.numpy as jnp
from jax.experimental import pallas as pl
from jax.experimental.pallas import tpu as pltpu

LANE = 128


def _make_kernel(hw_total, hw_chunk, acc_lane, n_tile):
    needs_mask = (hw_total % hw_chunk) != 0
    folds = hw_chunk // acc_lane
    num_chunks = -(-hw_total // hw_chunk)
    last_base = (num_chunks - 1) * hw_chunk  # element offset of the last chunk

    def kernel(x_ref, w1_ref, w2_ref, o_ref, sum_acc, max_acc):
        # x_ref : (n_tile, C, hw_chunk) chunk of the flattened spatial axis
        # w1_ref: (C, Hid)   (transposed 1x1 conv1 weight)
        # w2_ref: (Hid, C)   (transposed 1x1 conv2 weight)
        # o_ref : (n_tile, C) sigmoid attention weights
        k = pl.program_id(1)
        k_last = pl.num_programs(1) - 1

        @pl.when(k == 0)
        def _init():
            sum_acc[...] = jnp.zeros_like(sum_acc)
            max_acc[...] = jnp.full(max_acc.shape, -jnp.inf, dtype=max_acc.dtype)

        def _accumulate(masked):
            # Elementwise (VPU) accumulation into lane-wide running sum / max;
            # the expensive cross-lane (XLU) reduction is deferred to the
            # epilogue.  Loads are per fold slice (keeps VMEM pressure low).
            s = sum_acc[...]
            m = max_acc[...]
            for f in range(folds):
                lo = f * acc_lane
                if masked and (last_base + lo >= hw_total):
                    # Fold lies entirely in the padded tail: contributes 0 to
                    # the sum and -inf to the max -> skip it at trace time.
                    continue
                xs = x_ref[:, :, lo:lo + acc_lane].astype(jnp.float32)
                if masked and (last_base + lo + acc_lane > hw_total):
                    # Partially valid fold: narrow (1, 1, acc_lane) mask; the
                    # select broadcasts over (n_tile, C).  Keep SELECT
                    # semantics (not multiply-by-mask) so NaN garbage in the
                    # uninitialized padded tail cannot corrupt the sum.
                    lane_ids = jax.lax.broadcasted_iota(
                        jnp.int32, (1, 1, acc_lane), 2)
                    valid = lane_ids < (hw_total - last_base - lo)
                    s = s + jnp.where(valid, xs, 0.0)
                    m = jnp.maximum(m, jnp.where(valid, xs, -jnp.inf))
                else:
                    s = s + xs
                    m = jnp.maximum(m, xs)
            sum_acc[...] = s
            max_acc[...] = m

        if needs_mask:
            # Only the LAST HW chunk pays for masking; all other chunks run
            # the unmasked fast path (pure VPU add/max at HBM rate).
            @pl.when(k != k_last)
            def _fast():
                _accumulate(masked=False)

            @pl.when(k == k_last)
            def _tail():
                _accumulate(masked=True)
        else:
            _accumulate(masked=False)

        @pl.when(k == k_last)
        def _finalize():
            # Single lane (XLU) reduction per accumulator; scale by TRUE H*W.
            avg = jnp.sum(sum_acc[...], axis=-1) * (1.0 / hw_total)  # (n_tile, C)
            mx = jnp.max(max_acc[...], axis=-1)                      # (n_tile, C)

            # One shared-MLP pass over the stacked [avg; max] matrix.
            stacked = jnp.concatenate([avg, mx], axis=0)             # (2*n_tile, C)
            h = jnp.dot(stacked, w1_ref[...].astype(jnp.float32),
                        preferred_element_type=jnp.float32)          # (2*n_tile, Hid)
            h = jnp.maximum(h, 0.0)                                  # ReLU
            out2 = jnp.dot(h, w2_ref[...].astype(jnp.float32),
                           preferred_element_type=jnp.float32)       # (2*n_tile, C)
            logits = out2[:n_tile] + out2[n_tile:]
            o_ref[...] = jax.nn.sigmoid(logits).astype(o_ref.dtype)

    return kernel


def _pick_n_tile(N):
    # Prefer >=2 batch tiles (so both v7x TensorCores get work via the
    # "parallel" batch axis) and fatter tiles (up to 32) so the epilogue's
    # stacked MLP has more rows.  Tiles must be a multiple of 8 (or the whole
    # batch) to satisfy the (8,128) block rule on the (n_tile, C) output.
    divisors8 = [d for d in range(8, min(N, 32) + 1, 8) if N % d == 0]
    if not divisors8:
        # TODO(synk): for large N that is not a multiple of 8, pad the batch
        # instead of falling back to n_tile=N (keeps VMEM bounded).
        return N
    multi = [d for d in divisors8 if N // d >= 2]
    return max(multi) if multi else max(divisors8)


def channel_attention(x, w1_t, w2_t, *, hw_chunk=None, n_tile=None,
                      max_tile_bytes=16 * 1024 * 1024,
                      vmem_limit_bytes=48 * 1024 * 1024):
    """x: (N, C, H, W) NCHW, float32 or bfloat16.
    w1_t: (C, C//ratio)  -- transpose of torch conv1 weight squeezed.
    w2_t: (C//ratio, C)  -- transpose of torch conv2 weight squeezed.
    Returns (N, C, 1, 1) sigmoid attention weights (dtype of x).
    """
    N, C, H, W = x.shape
    hid = w1_t.shape[1]
    HW = H * W
    itemsize = x.dtype.itemsize

    if n_tile is None:
        n_tile = _pick_n_tile(N)
    assert N % n_tile == 0, "n_tile must divide N"

    # Spatial chunk: multiple of 128 lanes (or the full HW when HW < 128),
    # sized so (2 double-buffered x tiles) + (2 f32 accumulators) + headroom
    # stay inside the scoped VMEM limit (48 MiB < v7x's 64 MiB physical).
    if hw_chunk is None:
        if HW <= LANE:
            hw_chunk = HW
        else:
            acc_bytes = 2 * n_tile * C * LANE * 4
            budget = vmem_limit_bytes - acc_bytes - 4 * 1024 * 1024
            by_budget = budget // (2 * n_tile * C * itemsize)
            by_tile = max_tile_bytes // (n_tile * C * itemsize)
            cap = max(LANE, (min(by_budget, by_tile) // LANE) * LANE)
            hw_chunk = int(min(4096, cap, (HW // LANE) * LANE))
    num_chunks = pl.cdiv(HW, hw_chunk)
    acc_lane = min(hw_chunk, LANE)

    x_flat = x.reshape(N, C, HW)
    kernel = _make_kernel(HW, hw_chunk, acc_lane, n_tile)

    flops = 2 * N * C * HW + 2 * 2 * (2 * N) * C * hid
    bytes_accessed = N * C * HW * itemsize + (2 * C * hid + N * C) * 4

    out = pl.pallas_call(
        kernel,
        out_shape=jax.ShapeDtypeStruct((N, C), x.dtype),
        grid_spec=pltpu.PrefetchScalarGridSpec(
            num_scalar_prefetch=0,
            grid=(N // n_tile, num_chunks),
            in_specs=[
                pl.BlockSpec((n_tile, C, hw_chunk), lambda i, k: (i, 0, k)),
                # Constant index maps -> weights stay VMEM-resident across the
                # whole grid (tiny; double-buffering them costs ~nothing).
                pl.BlockSpec((C, hid), lambda i, k: (0, 0)),
                pl.BlockSpec((hid, C), lambda i, k: (0, 0)),
            ],
            out_specs=pl.BlockSpec((n_tile, C), lambda i, k: (i, 0)),
            scratch_shapes=[
                pltpu.VMEM((n_tile, C, acc_lane), jnp.float32),  # running sum
                pltpu.VMEM((n_tile, C, acc_lane), jnp.float32),  # running max
            ],
        ),
        compiler_params=pltpu.CompilerParams(
            dimension_semantics=("parallel", "arbitrary"),
            vmem_limit_bytes=vmem_limit_bytes,
        ),
        cost_estimate=pl.CostEstimate(
            flops=flops,
            transcendentals=N * C,
            bytes_accessed=bytes_accessed,
        ),
    )(x_flat, w1_t, w2_t)
    return out.reshape(N, C, 1, 1)


def reference(x, w1_t, w2_t):
    # Pure-JAX reference of the PyTorch forward for a sanity check.
    xf = x.astype(jnp.float32)
    avg = jnp.mean(xf, axis=(2, 3))            # (N, C)
    mx = jnp.max(xf, axis=(2, 3))              # (N, C)

    def mlp(v):
        return jnp.maximum(v @ w1_t, 0.0) @ w2_t

    return jax.nn.sigmoid(mlp(avg) + mlp(mx))[:, :, None, None]


if __name__ == "__main__":
    key = jax.random.PRNGKey(0)
    k_x1, k_x2, k_x3, k_w1, k_w2 = jax.random.split(key, 5)

    N, C, ratio = 2, 32, 16
    hid = C // ratio  # 2

    # torch conv1 weight: (C//r, C, 1, 1) -> w1_t = (C, C//r)
    # torch conv2 weight: (C, C//r, 1, 1) -> w2_t = (C//r, C)
    w1_t = jax.random.normal(k_w1, (C, hid), dtype=jnp.float32) * 0.1
    w2_t = jax.random.normal(k_w2, (hid, C), dtype=jnp.float32) * 0.1

    # Case 1: H*W = 256, forced 128-lane chunks -> exercises the multi-chunk
    # unmasked running-sum/max accumulation path of the grid.
    x1 = jax.random.normal(k_x1, (N, C, 16, 16), dtype=jnp.float32)
    out1 = jax.block_until_ready(channel_attention(x1, w1_t, w2_t, hw_chunk=128))
    ref1 = reference(x1, w1_t, w2_t)
    assert out1.shape == (N, C, 1, 1)
    assert jnp.allclose(out1, ref1, atol=1e-5, rtol=1e-5)

    # Case 2: H*W = 144 (not a multiple of 128) -> exercises the masked
    # partial tail chunk, now gated to the last chunk only.
    x2 = jax.random.normal(k_x2, (N, C, 12, 12), dtype=jnp.float32)
    out2 = jax.block_until_ready(channel_attention(x2, w1_t, w2_t))
    ref2 = reference(x2, w1_t, w2_t)
    assert jnp.allclose(out2, ref2, atol=1e-5, rtol=1e-5)

    # Case 3: N = 16 -> exercises the multi-batch-tile path (n_tile = 8,
    # two "parallel" grid units) together with the masked tail chunk.
    x3 = jax.random.normal(k_x3, (16, C, 12, 12), dtype=jnp.float32)
    out3 = jax.block_until_ready(channel_attention(x3, w1_t, w2_t))
    ref3 = reference(x3, w1_t, w2_t)
    assert out3.shape == (16, C, 1, 1)
    assert jnp.allclose(out3, ref3, atol=1e-5, rtol=1e-5)

    print("KERNEL_OK")
</pallas_src>

<mosaic_0001>
module attributes {stable_mosaic.version = 11 : i64} {
  func.func @kernel(%arg0: i32, %arg1: i32, %arg2: memref<2x32x128xf32, #tpu.memory_space<vmem>>, %arg3: memref<32x2xf32, #tpu.memory_space<vmem>>, %arg4: memref<2x32xf32, #tpu.memory_space<vmem>>, %arg5: memref<2x32xf32, #tpu.memory_space<vmem>>, %arg6: memref<2x32x128xf32, #tpu.memory_space<vmem>>, %arg7: memref<2x32x128xf32, #tpu.memory_space<vmem>>) attributes {dimension_semantics = [#tpu.dimension_semantics<parallel>, #tpu.dimension_semantics<arbitrary>], iteration_bounds = array<i64: 1, 2>, scalar_prefetch = 0 : i64, scratch_operands = 2 : i64, tpu.core_type = #tpu.core_type<tc>, window_params = [{transform_indices = @transform_0, window_bounds = array<i64: 2, 32, 128>}, {pipeline_mode = #tpu.pipeline_mode<synchronous>, transform_indices = @transform_1, window_bounds = array<i64: 32, 2>}, {pipeline_mode = #tpu.pipeline_mode<synchronous>, transform_indices = @transform_2, window_bounds = array<i64: 2, 32>}, {transform_indices = @transform_3, window_bounds = array<i64: 2, 32>}]} {
    %c0_i32 = arith.constant 0 : i32
    %0 = arith.cmpi eq, %arg1, %c0_i32 : i32
    %1 = arith.extui %0 : i1 to i32
    %c0_i32_0 = arith.constant 0 : i32
    %2 = arith.cmpi ne, %1, %c0_i32_0 : i32
    scf.if %2 {
      %cst = arith.constant 0.000000e+00 : f32
      %13 = vector.broadcast %cst : f32 to vector<2x32x128xf32>
      %c0_16 = arith.constant 0 : index
      %c0_17 = arith.constant 0 : index
      %c0_18 = arith.constant 0 : index
      %14 = vector.load %arg6[%c0_16, %c0_17, %c0_18] : memref<2x32x128xf32, #tpu.memory_space<vmem>>, vector<2x32x128xf32>
      tpu.vector_store %arg6[%c0_16, %c0_17, %c0_18], %13 {strides = array<i32>} : memref<2x32x128xf32, #tpu.memory_space<vmem>>, vector<2x32x128xf32>,
      %cst_19 = arith.constant 0xFF800000 : f32
      %15 = vector.broadcast %cst_19 : f32 to vector<2x32x128xf32>
      %c0_20 = arith.constant 0 : index
      %c0_21 = arith.constant 0 : index
      %c0_22 = arith.constant 0 : index
      %16 = vector.load %arg7[%c0_20, %c0_21, %c0_22] : memref<2x32x128xf32, #tpu.memory_space<vmem>>, vector<2x32x128xf32>
      tpu.vector_store %arg7[%c0_20, %c0_21, %c0_22], %15 {strides = array<i32>} : memref<2x32x128xf32, #tpu.memory_space<vmem>>, vector<2x32x128xf32>,
    } else {
    }
    %c0 = arith.constant 0 : index
    %c0_1 = arith.constant 0 : index
    %c0_2 = arith.constant 0 : index
    %3 = vector.load %arg6[%c0, %c0_1, %c0_2] : memref<2x32x128xf32, #tpu.memory_space<vmem>>, vector<2x32x128xf32>
    %c0_3 = arith.constant 0 : index
    %c0_4 = arith.constant 0 : index
    %c0_5 = arith.constant 0 : index
    %4 = vector.load %arg7[%c0_3, %c0_4, %c0_5] : memref<2x32x128xf32, #tpu.memory_space<vmem>>, vector<2x32x128xf32>
    %c0_6 = arith.constant 0 : index
    %c0_7 = arith.constant 0 : index
    %c0_8 = arith.constant 0 : index
    %5 = vector.load %arg2[%c0_6, %c0_7, %c0_8] : memref<2x32x128xf32, #tpu.memory_space<vmem>>, vector<2x32x128xf32>
    %6 = arith.addf %3, %5 : vector<2x32x128xf32>
    %7 = arith.maximumf %4, %5 : vector<2x32x128xf32>
    %c0_9 = arith.constant 0 : index
    %c0_10 = arith.constant 0 : index
    %c0_11 = arith.constant 0 : index
    %8 = vector.load %arg6[%c0_9, %c0_10, %c0_11] : memref<2x32x128xf32, #tpu.memory_space<vmem>>, vector<2x32x128xf32>
    tpu.vector_store %arg6[%c0_9, %c0_10, %c0_11], %6 {strides = array<i32>} : memref<2x32x128xf32, #tpu.memory_space<vmem>>, vector<2x32x128xf32>,
    %c0_12 = arith.constant 0 : index
    %c0_13 = arith.constant 0 : index
    %c0_14 = arith.constant 0 : index
    %9 = vector.load %arg7[%c0_12, %c0_13, %c0_14] : memref<2x32x128xf32, #tpu.memory_space<vmem>>, vector<2x32x128xf32>
    tpu.vector_store %arg7[%c0_12, %c0_13, %c0_14], %7 {strides = array<i32>} : memref<2x32x128xf32, #tpu.memory_space<vmem>>, vector<2x32x128xf32>,
    %c1_i32 = arith.constant 1 : i32
    %10 = arith.cmpi eq, %arg1, %c1_i32 : i32
    %11 = arith.extui %10 : i1 to i32
    %c0_i32_15 = arith.constant 0 : i32
    %12 = arith.cmpi ne, %11, %c0_i32_15 : i32
    scf.if %12 {
      %c0_16 = arith.constant 0 : index
      %c0_17 = arith.constant 0 : index
      %c0_18 = arith.constant 0 : index
      %13 = vector.load %arg6[%c0_16, %c0_17, %c0_18] : memref<2x32x128xf32, #tpu.memory_space<vmem>>, vector<2x32x128xf32>
      %cst = arith.constant dense<0.000000e+00> : vector<2x32xf32>
      %14 = vector.multi_reduction <add>, %13, %cst [2] : vector<2x32x128xf32> to vector<2x32xf32>
      %cst_19 = arith.constant 3.906250e-03 : f32
      %15 = vector.broadcast %cst_19 : f32 to vector<2x32xf32>
      %16 = arith.mulf %14, %15 : vector<2x32xf32>
      %c0_20 = arith.constant 0 : index
      %c0_21 = arith.constant 0 : index
      %c0_22 = arith.constant 0 : index
      %17 = vector.load %arg7[%c0_20, %c0_21, %c0_22] : memref<2x32x128xf32, #tpu.memory_space<vmem>>, vector<2x32x128xf32>
      %cst_23 = arith.constant dense<0xFF800000> : vector<2x32xf32>
      %18 = vector.multi_reduction <maximumf>, %17, %cst_23 [2] : vector<2x32x128xf32> to vector<2x32xf32>
      %19 = tpu.concatenate %16, %18 in 0 : vector<2x32xf32>, vector<2x32xf32> -> vector<4x32xf32>
      %c0_24 = arith.constant 0 : index
      %c0_25 = arith.constant 0 : index
      %20 = vector.load %arg3[%c0_24, %c0_25] : memref<32x2xf32, #tpu.memory_space<vmem>>, vector<32x2xf32>
      %cst_26 = arith.constant dense<0.000000e+00> : vector<4x2xf32>
      %21 = tpu.matmul %19, %20, %cst_26 {dimension_numbers = #tpu.dot_dimension_numbers<[1], [0], [0], [1], [0, 0, 1, 1], [], []>} : vector<4x32xf32>, vector<32x2xf32>, vector<4x2xf32> -> vector<4x2xf32>
      %cst_27 = arith.constant 0.000000e+00 : f32
      %22 = vector.broadcast %cst_27 : f32 to vector<4x2xf32>
      %23 = arith.maximumf %21, %22 : vector<4x2xf32>
      %c0_28 = arith.constant 0 : index
      %c0_29 = arith.constant 0 : index
      %24 = vector.load %arg4[%c0_28, %c0_29] : memref<2x32xf32, #tpu.memory_space<vmem>>, vector<2x32xf32>
      %cst_30 = arith.constant dense<0.000000e+00> : vector<4x32xf32>
      %25 = tpu.matmul %23, %24, %cst_30 {dimension_numbers = #tpu.dot_dimension_numbers<[1], [0], [0], [1], [0, 0, 1, 1], [], []>} : vector<4x2xf32>, vector<2x32xf32>, vector<4x32xf32> -> vector<4x32xf32>
      %26 = vector.extract_strided_slice %25 {offsets = [0, 0], sizes = [2, 32], strides = [1, 1]} : vector<4x32xf32> to vector<2x32xf32>
      %27 = vector.extract_strided_slice %25 {offsets = [2, 0], sizes = [2, 32], strides = [1, 1]} : vector<4x32xf32> to vector<2x32xf32>
      %28 = arith.addf %26, %27 : vector<2x32xf32>
      %29 = arith.negf %28 : vector<2x32xf32>
      %30 = math.exp %29 : vector<2x32xf32>
      %cst_31 = arith.constant 1.000000e+00 : f32
      %31 = vector.broadcast %cst_31 : f32 to vector<2x32xf32>
      %32 = arith.addf %31, %30 : vector<2x32xf32>
      %33 = arith.divf %31, %32 : vector<2x32xf32>
      %c0_32 = arith.constant 0 : index
      %c0_33 = arith.constant 0 : index
      %34 = vector.load %arg5[%c0_32, %c0_33] : memref<2x32xf32, #tpu.memory_space<vmem>>, vector<2x32xf32>
      tpu.vector_store %arg5[%c0_32, %c0_33], %33 {strides = array<i32>} : memref<2x32xf32, #tpu.memory_space<vmem>>, vector<2x32xf32>,
    } else {
    }
    return
  }
  func.func @transform_0(%arg0: i32, %arg1: i32) -> (i32, i32, i32) {
    %c0_i32 = arith.constant 0 : i32
    %c0_i32_0 = arith.constant 0 : i32
    return %arg0, %c0_i32, %arg1 : i32, i32, i32
  }
  func.func @transform_1(%arg0: i32, %arg1: i32) -> (i32, i32) {
    %c0_i32 = arith.constant 0 : i32
    %c0_i32_0 = arith.constant 0 : i32
    %c0_i32_1 = arith.constant 0 : i32
    return %c0_i32, %c0_i32_0 : i32, i32
  }
  func.func @transform_2(%arg0: i32, %arg1: i32) -> (i32, i32) {
    %c0_i32 = arith.constant 0 : i32
    %c0_i32_0 = arith.constant 0 : i32
    %c0_i32_1 = arith.constant 0 : i32
    return %c0_i32, %c0_i32_0 : i32, i32
  }
  func.func @transform_3(%arg0: i32, %arg1: i32) -> (i32, i32) {
    %c0_i32 = arith.constant 0 : i32
    %c0_i32_0 = arith.constant 0 : i32
    return %arg0, %c0_i32 : i32, i32
  }
}

</mosaic_0001>

<bundles_post_ra>
// kernel: tpu_custom_call.1
= control target key start
LH: loop header
LB: loop body
LE: loop exit
PB: predicated region body
PF: predicated region fallthrough
CT: control target
= control target key end

     0   :  { %8 = vsyncpa [#allocation5], 0  ;;  %s1136_s0 = inlined_call_operand.hbm [shape: f32[2,32,256], index: 0, kind: input, shape index: {}]   ;;  %s1137_s1 = inlined_call_operand.vmem [shape: f32[32,2], index: 1, kind: input, shape index: {}]   ;;  %s1138_s2 = inlined_call_operand.vmem [shape: f32[2,32], index: 2, kind: input, shape index: {}]   ;;  %s1139_s3 = inlined_call_operand.hbm [shape: f32[2,32], index: 3, kind: output, shape index: {}]  }
   0x1   :  { %10 = vsyncpa [#allocation5 + $0x1], 0 }
   0x2   :  { %11 = vsyncpa [#allocation6], 0  ;;  %s946_s12 = smov 0   ;;  %s948_s13 = smov 0  }
   0x3   :  { %s950_s14 = smov 0   ;;  %s952_s15 = smov 0  }
   0x4   :  { %s954_s16 = smov 0   ;;  %s956_s17 = smov 0  }
   0x5 LB: > { %s684_s18 = sadd.s32 4294967295, %s914_s17   ;;  %s26_s19 = sadd.s32 1, %s910_s16  ;;  %s914_s17 = sphi %s956_s17, %s17_s17   ;;  %s910_s16 = sphi %s954_s16, %s1149_s16   ;;  %s906_s15 = sphi %s952_s15, %s1148_s15   ;;  %s902_s14 = sphi %s950_s14, %s1147_s14   ;;  %s898_s13 = sphi %s948_s13, %s1146_s13   ;;  %s894_s12 = sphi %s946_s12, %s1145_s12  }
   0x6   : > { %p27_p0 = scmp.ge.s32.totalorder %s26_s19, 2  ;;  %s38_s20 = sadd.s32 1, %s902_s14 }
   0x7   : > { %p45_p1 = scmp.ne.s32.totalorder %s902_s14, %s898_s13  ;;  %p46_p2 = scmp.eq.s32.totalorder %s914_s17, 0 }
   0x8   : > { %s1151_s19 = smov (%p27_p0, %s26_s19), 0  ;;  %p51_p4 = scmp.ne.s32.totalorder %s898_s13, %s894_s12 }
   0x9   : > { %p982_p3 = por %p46_p2, %p45_p1  ;;  %s34_s22 = ssub.s32 %s910_s16, %s1151_s19 }
   0xa   : > { %p52_p5 = scmp.eq.s32.totalorder %s684_s18, 0  ;;  %p36_p6 = scmp.eq.s32.totalorder %s34_s22, 0 }
   0xb   : > { %p740_p8 = scmp.lt.s32.totalorder %s914_s17, 2  ;;  %s149_s25 = sand.u32 1, %s902_s14  }
   0xc   : > { %p991_p7 = por %p52_p5, %p51_p4  ;;  %s688_s26 = sshll.u32 %s910_s16, 7 }
   0xd   : > { %s997_s24 = scalar_select %p36_p6, %s902_s14, %s38_s20  }
   0xe   : > { %s687_s27 = sshll.u32 %s149_s25, 6  ;;  %s1004_s30 = scalar_lea.hbm %s1136_s0, %s688_s26 }
   0xf   : > { %s153_s4 = scalar_lea.vmem [#allocation4], %s687_s27  ;;  %p1008_p9 = pnand %p740_p8, %p982_p3 }
  0x10   : > { %s162_s5 = sshll.u32 %s153_s4, 4  ;;  %s1015_s7 = scalar_lea.sflag [#allocation5], %s149_s25  ;;  %s1012_s5 = int_to_ptr.vmem [resolvable:$true] %s162_s5 }
  0x11   : > { %s804_s8 = scalar_lea.hbm %s1004_s30, 1024  ;;  %p806_p12 = pneg %p1008_p9 }
  0x12   : > { %p805_p11 = scmp.ne.s32.totalorder %s1004_s30, %s804_s8  ;;  %s809_s11 = scalar_lea.hbm %s1136_s0, 2048 }
  0x13   : > { %p810_p1 = scmp.lt.u32.totalorder %s1004_s30, %s1136_s0  ;;  %p811_p2 = scmp.lt.u32.totalorder %s809_s11, %s804_s8 }
  0x14   : > { %p807_p13 = pnand %p806_p12, %p805_p11  ;;  %p813_p4 = scmp.lt.u32.totalorder %s804_s8, %s1004_s30 }
  0x15   : > { %p812_p3 = por %p811_p2, %p810_p1 }
  0x16   : > { %p808_p0 = pneg %p807_p13 }
  0x17   : > { %p814_p5 = por %p813_p4, %p812_p3 }
  0x19   : > { %p815_p6 = pnand %p814_p5, %p808_p0 }
  0x1b   : > { %818 = shalt.err (!%p815_p6)
}
  0x1c   : > { %s819_s21 = scalar_lea.vmem %s1012_s5, 1024  ;;  %s916_s22 = smov [#allocation4]  }
  0x1d   : > { %p820_p8 = scmp.ne.s32.totalorder %s1012_s5, %s819_s21  ;;  %s824_s25 = sshll.u32 %s916_s22, 4  ;;  %s825_s25 = int_to_ptr.vmem [resolvable:$false] %s824_s25 }
  0x1e   : > { %s826_s26 = scalar_lea.vmem %s825_s25, 2048  ;;  %p827_p10 = scmp.lt.s32.totalorder %s1012_s5, %s825_s25 }
  0x1f   : > { %p822_p11 = pnand %p820_p8, %p806_p12  ;;  %p828_p1 = scmp.lt.s32.totalorder %s826_s26, %s819_s21 }
  0x21   : > { %p823_p13 = pneg %p822_p11  ;;  %p829_p2 = por %p828_p1, %p827_p10 }
  0x23   : > { %p830_p3 = pnand %p829_p2, %p823_p13 }
  0x25   : > { %833 = shalt.err (!%p830_p3)
}
  0x26   : > { %s917_s27 = smov 256   ;;  %s918_s28 = smov 128  }
  0x27   : > { %s919_s29 = smov 8   ;;  %p170_p12 = scmp.lt.s32.totalorder %s914_s17, 3 }
  0x28   : > { %739 = dma.hbm_to_vmem [thread:$0]  (!%p1008_p9), %s1004_s30, 1024, %s1012_s5, %s1015_s7, %s917_s27, %s918_s28, %s919_s29  }
  0x29   : > { %p1143_p0 = scmp.ge.s32.totalorder %s914_s17, 1 }
  0x2b   : > { %p171_p4 = pnand %p1143_p0, %p170_p12 }
  0x2c   : > { %s176_s4 = sand.u32 (!%p171_p4), 1, %s898_s13  }
  0x2d   : > { %174 = sbr.rel (%p171_p4) target bundleno = 734 (0x2de), region = 32  ;;  %s690_s8 = sshll.u32 (!%p171_p4), %s176_s4, 6 }
  0x2e   : > { %s177_s9 = scalar_lea.sflag (!%p171_p4), [#allocation5], %s176_s4  ;;  %s1047_s10 = scalar_lea.vmem (!%p171_p4), [#allocation4], %s690_s8 }
  0x34   : > { %885 = dma.done.wait (%p991_p7), %s177_s9, 1024  }
  0x35   : > { %887 = vsyncadd (%p991_p7), %s177_s9, 4294966272  ;;  %p691_p10 = scmp.ne.s32.totalorder %s906_s15, 0 }
  0x36   : > { %v920_v0 = vmov (!%p691_p10), 0.0   ;;  %v921_v1 = vmov (!%p691_p10), -inf  }
  0x37   : > { %202 = sbr.rel (%p691_p10) target bundleno = 63 (0x3f), region = 40  ;;  %203 = vst [vmem:[#allocation2] sm:$0xff] (!%p691_p10), %v920_v0  ;;  %204 = vst [vmem:[#allocation2 + $0x8] sm:$0xff] (!%p691_p10), %v920_v0 }
  0x38   : > { %205 = vst [vmem:[#allocation2 + $0x10] sm:$0xff] (!%p691_p10), %v920_v0  ;;  %206 = vst [vmem:[#allocation2 + $0x18] sm:$0xff] (!%p691_p10), %v920_v0 }
  0x39   : > { %207 = vst [vmem:[#allocation2 + $0x20] sm:$0xff] (!%p691_p10), %v920_v0  ;;  %208 = vst [vmem:[#allocation2 + $0x28] sm:$0xff] (!%p691_p10), %v920_v0 }
  0x3a   : > { %209 = vst [vmem:[#allocation2 + $0x30] sm:$0xff] (!%p691_p10), %v920_v0  ;;  %210 = vst [vmem:[#allocation2 + $0x38] sm:$0xff] (!%p691_p10), %v920_v0 }
  0x3b   : > { %211 = vst [vmem:[#allocation3] sm:$0xff] (!%p691_p10), %v921_v1  ;;  %212 = vst [vmem:[#allocation3 + $0x8] sm:$0xff] (!%p691_p10), %v921_v1 }
  0x3c   : > { %213 = vst [vmem:[#allocation3 + $0x10] sm:$0xff] (!%p691_p10), %v921_v1  ;;  %214 = vst [vmem:[#allocation3 + $0x18] sm:$0xff] (!%p691_p10), %v921_v1 }
  0x3d   : > { %215 = vst [vmem:[#allocation3 + $0x20] sm:$0xff] (!%p691_p10), %v921_v1  ;;  %216 = vst [vmem:[#allocation3 + $0x28] sm:$0xff] (!%p691_p10), %v921_v1 }
  0x3e   : > { %217 = vst [vmem:[#allocation3 + $0x30] sm:$0xff] %v921_v1  ;;  %218 = vst [vmem:[#allocation3 + $0x38] sm:$0xff] %v921_v1 }
  0x3f PF: > { %v219_v2 = vld [vmem:[#allocation2] sm:$0xff]  ;;  %v220_v4 = vld [vmem:[#allocation2 + $0x8] sm:$0xff]  ;;  %v237_v8 = vld [vmem:[%s1047_s10 + $0x10] sm:$0xff]  ;;  %p692_p7 = scmp.ne.s32.totalorder %s906_s15, 1 }
  0x40   : > { %v235_v3 = vld [vmem:[%s1047_s10] sm:$0xff]  ;;  %v236_v6 = vld [vmem:[%s1047_s10 + $0x8] sm:$0xff]  ;;  %v221_v7 = vld [vmem:[#allocation2 + $0x10] sm:$0xff]  ;;  %v922_v61 = vmov (!%p692_p7), 0.0|0.0   ;;  %vm923_vm0 = vmmov (!%p692_p7), 0   ;;  %v924_v1 = vmov (!%p692_p7), 0.0  }
  0x41   : > { %v243_v5 = vadd.f32 %v235_v3, %v219_v2  ;;  %v244_v9 = vadd.f32 %v236_v6, %v220_v4  ;;  %v245_v10 = vadd.f32 %v237_v8, %v221_v7  ;;  %v222_v11 = vld [vmem:[#allocation2 + $0x18] sm:$0xff]  ;;  %v223_v13 = vld [vmem:[#allocation2 + $0x20] sm:$0xff]  ;;  %v224_v16 = vld [vmem:[#allocation2 + $0x28] sm:$0xff]  ;;  %724 = vmatprep.subr.bf16.mxu0 (!%p692_p7), %v922_v61  ;;  %716 = vmatprep.mubr.msk.f32.mxu0 (!%p692_p7), %vm923_vm0, %v924_v1  ;;  %vm354_vm1 = vcmask (!%p692_p7), 130112  }
  0x42   : > { %v238_v12 = vld [vmem:[%s1047_s10 + $0x18] sm:$0xff]  ;;  %v239_v15 = vld [vmem:[%s1047_s10 + $0x20] sm:$0xff]  ;;  %v240_v17 = vld [vmem:[%s1047_s10 + $0x28] sm:$0xff]  ;;  %719 = vmatprep.subr.mxu1 (!%p692_p7), %v924_v1  ;;  %721 = vmatprep.mubr.msk.f32.mxu1 (!%p692_p7), %vm923_vm0, %v924_v1  ;;  %vm361_vm2 = vcmask (!%p692_p7), 195712   ;;  %vm368_vm3 = vcmask (!%p692_p7), 261312   ;;  %vm389_vm4 = vcmask (!%p692_p7), 1041409  }
  0x43   : > { %259 = vst [vmem:[#allocation2] sm:$0xff] %v243_v5  ;;  %v246_v14 = vadd.f32 %v238_v12, %v222_v11  ;;  %260 = vst [vmem:[#allocation2 + $0x8] sm:$0xff] %v244_v9  ;;  %v247_v18 = vadd.f32 %v239_v15, %v223_v13  ;;  %v248_v19 = vadd.f32 %v240_v17, %v224_v16  ;;  %v225_v20 = vld [vmem:[#allocation2 + $0x30] sm:$0xff]  ;;  %v226_v22 = vld [vmem:[#allocation2 + $0x38] sm:$0xff]  ;;  %vm438_vm5 = vcmask (!%p692_p7), 1043459  }
  0x44   : > { %261 = vst [vmem:[#allocation2 + $0x10] sm:$0xff] %v245_v10  ;;  %v241_v21 = vld [vmem:[%s1047_s10 + $0x30] sm:$0xff]  ;;  %v242_v24 = vld [vmem:[%s1047_s10 + $0x38] sm:$0xff]  ;;  %v227_v25 = vld [vmem:[#allocation3] sm:$0xff]  ;;  %vm441_vm6 = vcmask (!%p692_p7), 1041408   ;;  %vm447_vm7 = vcmask (!%p692_p7), 261120  }
  0x45   : > { %262 = vst [vmem:[#allocation2 + $0x18] sm:$0xff] %v246_v14  ;;  %v249_v23 = vadd.f32 %v241_v21, %v225_v20  ;;  %v228_v26 = vld [vmem:[#allocation3 + $0x8] sm:$0xff]  ;;  %263 = vst [vmem:[#allocation2 + $0x20] sm:$0xff] %v247_v18  ;;  %v250_v27 = vadd.f32 %v242_v24, %v226_v22  ;;  %v251_v28 = vmax.f32 %v227_v25, %v235_v3  ;;  %v229_v30 = vld [vmem:[#allocation3 + $0x10] sm:$0xff]  ;;  %278 = sbr.rel (%p692_p7) target bundleno = 709 (0x2c5), region = 44  ;;  %vm523_vm8 = vcmask (!%p692_p7), 15360  }
  0x46   : > { %264 = vst [vmem:[#allocation2 + $0x28] sm:$0xff] %v248_v19  ;;  %v252_v29 = vmax.f32 %v228_v26, %v236_v6  ;;  %v230_v31 = vld [vmem:[#allocation3 + $0x18] sm:$0xff]  ;;  %v231_v32 = vld [vmem:[#allocation3 + $0x20] sm:$0xff]  ;;  %v253_v33 = vmax.f32 %v229_v30, %v237_v8  ;;  %v232_v36 = vld [vmem:[#allocation3 + $0x28] sm:$0xff]  ;;  %v343_v6 = vlaneseq (!%p692_p7)  ;;  %vm610_vm9 = vcmask (!%p692_p7), 254976  }
  0x47   : > { %265 = vst [vmem:[#allocation2 + $0x30] sm:$0xff] %v249_v23  ;;  %v254_v34 = vmax.f32 %v230_v31, %v238_v12  ;;  %v255_v35 = vmax.f32 %v231_v32, %v239_v15  ;;  %v233_v37 = vld [vmem:[#allocation3 + $0x30] sm:$0xff]  ;;  %v234_v38 = vld [vmem:[#allocation3 + $0x38] sm:$0xff]  ;;  %266 = vst [vmem:[#allocation2 + $0x38] sm:$0xff] %v250_v27  ;;  %v256_v39 = vmax.f32 %v232_v36, %v240_v17 }
  0x48   : > { %267 = vst [vmem:[#allocation3] sm:$0xff] %v251_v28  ;;  %268 = vst [vmem:[#allocation3 + $0x8] sm:$0xff] %v252_v29  ;;  %v257_v40 = vmax.f32 %v233_v37, %v241_v21  ;;  %v258_v41 = vmax.f32 %v234_v38, %v242_v24  ;;  %v443_v58 = vld [vmem:[%s1137_s1] sm:$0xff] (!%p692_p7)  ;;  %v444_v59 = vld [vmem:[%s1137_s1 + $0x8] sm:$0xff] (!%p692_p7)  ;;  %v344_v9 = vand.u32 (!%p692_p7), 127, %v343_v6  ;;  %v346_v12 = vshrl.u32 (!%p692_p7), %v343_v6, 7 }
  0x49   : > { %269 = vst [vmem:[#allocation3 + $0x10] sm:$0xff] %v253_v33  ;;  %270 = vst [vmem:[#allocation3 + $0x18] sm:$0xff] %v254_v34  ;;  %v725_v60 = vpack.c.bf16 (!%p692_p7), %v444_v59, %v443_v58  ;;  %v445_v62 = vld [vmem:[%s1137_s1 + $0x10] sm:$0xff] (!%p692_p7)  ;;  %v446_v63 = vld [vmem:[%s1137_s1 + $0x18] sm:$0xff] (!%p692_p7) }
  0x4a   : > { %271 = vst [vmem:[#allocation3 + $0x20] sm:$0xff] %v255_v35  ;;  %272 = vst [vmem:[#allocation3 + $0x28] sm:$0xff] %v256_v39  ;;  %v279_v43 = vld [vmem:[#allocation2] sm:$0xff] (!%p692_p7)  ;;  %v280_v45 = vld [vmem:[#allocation2 + $0x8] sm:$0xff] (!%p692_p7)  ;;  %v728_v0 = vpack.c.bf16 (!%p692_p7), %v446_v63, %v445_v62  ;;  %v349_v13 = vadd.s32 (!%p692_p7), 4294967288, %v344_v9  ;;  %v356_v14 = vadd.s32 (!%p692_p7), 4294967280, %v344_v9  ;;  %v347_v18 = vsub.s32 (!%p692_p7), %v344_v9, %v346_v12 }
  0x4b   : > { %273 = vst [vmem:[#allocation3 + $0x30] sm:$0xff] %v257_v40  ;;  %274 = vst [vmem:[#allocation3 + $0x38] sm:$0xff] %v258_v41  ;;  %287 = vadd.xlane.f32.xlu0 (!%p692_p7), %v279_v43  ;;  %v281_v47 = vld [vmem:[#allocation2 + $0x10] sm:$0xff] (!%p692_p7)  ;;  %726 = vmatpush3.bf16.msra.mxu0 (!%p692_p7), %v725_v60  ;;  %v363_v15 = vadd.s32 (!%p692_p7), 4294967272, %v344_v9 }
  0x4c   : > { %v283_v42 = vld [vmem:[#allocation2 + $0x20] sm:$0xff]  ;;  %v282_v49 = vld [vmem:[#allocation2 + $0x18] sm:$0xff]  ;;  %727 = vmatprep.subr.bf16.mxu0 %v922_v61  ;;  %v352_v19 = vsub.s32 %v349_v13, %v346_v12  ;;  %v359_v22 = vsub.s32 %v356_v14, %v346_v12 }
  0x4d   : > { %295 = vadd.xlane.f32.xlu1 %v283_v42  ;;  %v284_v44 = vld [vmem:[#allocation2 + $0x28] sm:$0xff]  ;;  %v366_v25 = vsub.s32 %v363_v15, %v346_v12 }
  0x4e   : > { %v285_v46 = vld [vmem:[#allocation2 + $0x30] sm:$0xff]  ;;  %v286_v48 = vld [vmem:[#allocation2 + $0x38] sm:$0xff] }
  0x4f   : > { %289 = vadd.xlane.f32.xlu0 %v280_v45  ;;  %v312_v50 = vld [vmem:[#allocation3 + $0x8] sm:$0xff]  ;;  %v311_v51 = vld [vmem:[#allocation3] sm:$0xff]  ;;  %729 = vmatpush3.bf16.msra.mxu0 %v728_v0 }
  0x50   : > { %v313_v55 = vld [vmem:[#allocation3 + $0x10] sm:$0xff]  ;;  %v314_v57 = vld [vmem:[#allocation3 + $0x18] sm:$0xff] }
  0x51   : > { %297 = vadd.xlane.f32.xlu1 %v284_v44  ;;  %v316_v52 = vld [vmem:[#allocation3 + $0x28] sm:$0xff]  ;;  %v315_v53 = vld [vmem:[#allocation3 + $0x20] sm:$0xff] }
  0x52   : > { %v317_v54 = vld [vmem:[#allocation3 + $0x30] sm:$0xff]  ;;  %v318_v56 = vld [vmem:[#allocation3 + $0x38] sm:$0xff] }
  0x53   : > { %291 = vadd.xlane.f32.xlu0 %v281_v47 }
  0x55   : > { %299 = vadd.xlane.f32.xlu1 %v285_v46 }
  0x57   : > { %293 = vadd.xlane.f32.xlu0 %v282_v49 }
  0x59   : > { %301 = vadd.xlane.f32.xlu1 %v286_v48 }
  0x5b   : > { %319 = vmax.xlane.f32.xlu0 %v311_v51 }
  0x5d   : > { %321 = vmax.xlane.f32.xlu1 %v312_v50 }
  0x5f   : > { %327 = vmax.xlane.f32.xlu0 %v315_v53 }
  0x61   : > { %329 = vmax.xlane.f32.xlu1 %v316_v52 }
  0x63   : > { %323 = vmax.xlane.f32.xlu0 %v313_v55 }
  0x65   : > { %331 = vmax.xlane.f32.xlu1 %v317_v54 }
  0x67   : > { %325 = vmax.xlane.f32.xlu0 %v314_v57 }
  0x69   : > { %333 = vmax.xlane.f32.xlu1 %v318_v56 }
  0xd8   : > { %v288_v3 = vpop.xlane.xlu0 %287 }
  0xd9   : > { %v303_v27 = vmul.f32 0.00390625, %v288_v3  ;;  %v522_v3 = vld [vmem:[%s1138_s2] sm:$0x3] }
  0xda   : > { %v296_v2 = vpop.xlane.xlu1 %295  ;;  %720 = vmatpush3.msk.msra.mxu1 %vm441_vm6, %v522_v3 }
  0xdb   : > { %v307_v26 = vmul.f32 0.00390625, %v296_v2  ;;  %v348_v37 = vrot.slane %v303_v27, %v347_v18 }
  0xdc   : > { %v290_v5 = vpop.xlane.xlu0 %289 }
  0xdd   : > { %v304_v21 = vmul.f32 0.00390625, %v290_v5  ;;  %v373_v36 = vrot.slane %v307_v26, %v347_v18 }
  0xde   : > { %v298_v4 = vpop.xlane.xlu1 %297 }
  0xdf   : > { %v308_v20 = vmul.f32 0.00390625, %v298_v4  ;;  %v353_v33 = vrot.slane %v304_v21, %v352_v19 }
  0xe0   : > { %v292_v8 = vpop.xlane.xlu0 %291 }
  0xe1   : > { %v305_v24 = vmul.f32 0.00390625, %v292_v8  ;;  %v377_v32 = vrot.slane %v308_v20, %v352_v19  ;;  %v355_v47 = vsel %vm354_vm1, %v353_v33, %v348_v37 }
  0xe2   : > { %v300_v7 = vpop.xlane.xlu1 %299 }
  0xe3   : > { %v309_v23 = vmul.f32 0.00390625, %v300_v7  ;;  %v360_v35 = vrot.slane %v305_v24, %v359_v22  ;;  %v378_v46 = vsel %vm354_vm1, %v377_v32, %v373_v36 }
  0xe4   : > { %v294_v11 = vpop.xlane.xlu0 %293 }
  0xe5   : > { %v306_v29 = vmul.f32 0.00390625, %v294_v11  ;;  %v382_v34 = vrot.slane %v309_v23, %v359_v22  ;;  %v362_v51 = vsel %vm361_vm2, %v360_v35, %v355_v47 }
  0xe6   : > { %v302_v10 = vpop.xlane.xlu1 %301 }
  0xe7   : > { %v310_v28 = vmul.f32 0.00390625, %v302_v10  ;;  %v367_v39 = vrot.slane %v306_v29, %v366_v25  ;;  %v383_v50 = vsel %vm361_vm2, %v382_v34, %v378_v46 }
  0xe8   : > { %v320_v17 = vpop.xlane.xlu0 %319 }
  0xe9   : > { %v387_v38 = vrot.slane %v310_v28, %v366_v25  ;;  %v403_v43 = vrot.slane %v320_v17, %v347_v18  ;;  %v369_v53 = vsel %vm368_vm3, %v367_v39, %v362_v51 }
  0xea   : > { %v322_v16 = vpop.xlane.xlu1 %321 }
  0xeb   : > { %v407_v42 = vrot.slane %v322_v16, %v352_v19  ;;  %v388_v52 = vsel %vm368_vm3, %v387_v38, %v383_v50 }
  0xec   : > { %v328_v31 = vpop.xlane.xlu0 %327  ;;  %v390_v0 = vsel %vm389_vm4, %v388_v52, %v369_v53 }
  0xed   : > { %v422_v45 = vrot.slane %v328_v31, %v347_v18  ;;  %v408_v56 = vsel %vm354_vm1, %v407_v42, %v403_v43 }
  0xee   : > { %v330_v30 = vpop.xlane.xlu1 %329 }
  0xef   : > { %v426_v44 = vrot.slane %v330_v30, %v352_v19 }
  0xf0   : > { %v324_v41 = vpop.xlane.xlu0 %323 }
  0xf1   : > { %v412_v49 = vrot.slane %v324_v41, %v359_v22  ;;  %v427_v57 = vsel %vm354_vm1, %v426_v44, %v422_v45 }
  0xf2   : > { %v332_v40 = vpop.xlane.xlu1 %331 }
  0xf3   : > { %v431_v48 = vrot.slane %v332_v40, %v359_v22  ;;  %v413_v61 = vsel %vm361_vm2, %v412_v49, %v408_v56 }
  0xf4   : > { %v326_v55 = vpop.xlane.xlu0 %325 }
  0xf5   : > { %v417_v59 = vrot.slane %v326_v55, %v366_v25  ;;  %v432_v60 = vsel %vm361_vm2, %v431_v48, %v427_v57 }
  0xf6   : > { %v334_v54 = vpop.xlane.xlu1 %333 }
  0xf7   : > { %v436_v58 = vrot.slane %v334_v54, %v366_v25  ;;  %v418_v63 = vsel %vm368_vm3, %v417_v59, %v413_v61 }
  0xf9   : > { %v437_v62 = vsel %vm368_vm3, %v436_v58, %v432_v60 }
  0xfa   : > { %v439_v1 = vsel %vm438_vm5, %v437_v62, %v418_v63 }
  0xfb   : > { %v442_v2 = vsel %vm441_vm6, %v390_v0, %v439_v1 }
  0xfc   : > { %717 = vmatmul.mubr.msk.f32.vlgmr.msra.gmra.mrb[0].mxu0 %vm447_vm7, %v442_v2 }
 0x1cf   : > { %v517_v4 = vpop.f32.mrb[0].mxu0 }
 0x1d0   : > { %v521_v5 = vmax.f32 %v517_v4, 0.0  ;;  %v718_v6 = vpop.f32.mrb[1].mxu0 }
 0x1d2   : > { %722 = vmatmul.mubr.msk.f32.vlgmr.msra.gmra.mrb[0].mxu1 %vm523_vm8, %v521_v5 }
 0x2a5   : > { %v596_v7 = vpop.f32.mrb[0].mxu1 }
 0x2a6   : > { %v601_v8 = vrot.slane %v596_v7, 2  ;;  %v723_v9 = vpop.f32.mrb[1].mxu1 }
 0x2a8   : > { %v603_v10 = vadd.f32 %v601_v8, %v596_v7 }
 0x2aa   : > { %v696_v11 = vmul.f32 -1.442695, %v603_v10 }
 0x2ac   : > { %800 = vpow2.f32 %v696_v11 }
 0x2b6   : > { %v801_v12 = vpop.eup %800 }
 0x2b7   : > { %v607_v13 = vadd.f32 1.0, %v801_v12 }
 0x2b9   : > { %802 = vrcp.f32 %v607_v13 }
 0x2c3   : > { %v803_v14 = vpop.eup %802 }
 0x2c4   : > { %611 = vst.msk [vmem:[#allocation7] sm:$0x3] %vm610_vm9, %v803_v14 }
 0x2c5 PF: > { %p1092_p9 = scmp.eq.s32.totalorder %s684_s18, 1  ;;  %s925_s25 = smov [#allocation7]  }
 0x2c6   : > { %s621_s26 = sshll.u32 %s925_s25, 4  ;;  %s622_s26 = int_to_ptr.vmem [resolvable:$true] %s621_s26 }
 0x2c7   : > { %s834_s27 = scalar_lea.vmem %s622_s26, 32  ;;  %p841_p11 = scmp.lt.s32.totalorder %s622_s26, %s622_s26 }
 0x2c8   : > { %p835_p5 = scmp.ne.s32.totalorder %s622_s26, %s834_s27  ;;  %p842_p13 = scmp.lt.s32.totalorder %s834_s27, %s834_s27 }
 0x2ca   : > { %p836_p6 = pnand %p835_p5, %p1092_p9  ;;  %p843_p1 = por %p842_p13, %p841_p11 }
 0x2cc   : > { %p837_p8 = pneg %p836_p6 }
 0x2ce   : > { %p844_p2 = pnand %p843_p1, %p837_p8 }
 0x2d0   : > { %847 = shalt.err (!%p844_p2)
}
 0x2d1   : > { %s848_s18 = scalar_lea.hbm %s1139_s3, 32 }
 0x2d2   : > { %p849_p3 = scmp.ne.s32.totalorder %s1139_s3, %s848_s18  ;;  %p854_p4 = scmp.lt.u32.totalorder %s848_s18, %s1139_s3 }
 0x2d4   : > { %p850_p12 = pnand %p849_p3, %p1092_p9 }
 0x2d6   : > { %p851_p0 = pneg %p850_p12 }
 0x2d8   : > { %p856_p10 = pnand %p854_p4, %p851_p0 }
 0x2da   : > { %859 = shalt.err (!%p856_p10)
}
 0x2db   : > { %733 = dma.vmem_to_hbm [thread:$0]  (%p1092_p9), %s622_s26, 32, %s1139_s3, [#allocation6]  }
 0x2dc   : > { %889 = dma.done.wait (%p1092_p9), [#allocation6], 32  }
 0x2dd   : > { %891 = vsyncadd (%p1092_p9), [#allocation6], 4294967264 }
 0x2de PF: > { %s17_s17 = sadd.s32 1, %s914_s17   ;;  %s1145_s12 = smov %s898_s13 }
 0x2df   : > { %p14_p7 = scmp.ge.s32.totalorder %s17_s17, 4   ;;  %s1146_s13 = smov %s902_s14 }
 0x2e0   : > { %s1147_s14 = smov %s997_s24  ;;  %s1148_s15 = smov %s910_s16 }
 0x2e1   : > { %s1149_s16 = smov %s1151_s19  ;;  %16 = sbr.rel (!%p14_p7) target bundleno = 5 (0x5), region = 78 }
 0x2e8   :  { %634 = vsyncpa [#allocation5], 1 }
 0x2e9   :  { %636 = vsyncpa [#allocation5 + $0x1], 1 }
 0x2ea   :  { %637 = vsyncpa [#allocation6], 1 }
 0x2eb   :  { %639 = vsyncpa [#allocation6 + $0x1], 1 }

</bundles_post_ra>
